<compile_context>
chip_gen: v5e
topology: v5e:2x2
jax: 0.10.0
libtpu: 0.0.40
codegen_flags: <defaults>
</compile_context>

<pallas_src>
import functools

import jax
import jax.numpy as jnp
from jax.experimental import pallas as pl
from jax.experimental.pallas import tpu as pltpu


def _round_up(x, m):
    return ((x + m - 1) // m) * m


# ---------------------------------------------------------------------------
# Kernels
# ---------------------------------------------------------------------------

def _fused_kernel(adj_ref, x_ref, w_ref, o_ref):
    """Small-N path: out[row-block] = (adj[row-block, :] @ x) @ W, all resident."""
    h = jnp.dot(adj_ref[...], x_ref[...], preferred_element_type=jnp.float32)
    o_ref[...] = jnp.dot(h.astype(w_ref.dtype), w_ref[...],
                         preferred_element_type=jnp.float32)


def _xw_kernel(x_ref, w_ref, o_ref):
    """Stage 1 (large-N path): xw = x @ W_pad."""
    o_ref[...] = jnp.dot(x_ref[...], w_ref[...],
                         preferred_element_type=jnp.float32).astype(o_ref.dtype)


def _adj_xw_resident_kernel(adj_ref, xw_ref, o_ref):
    """Stage 2, xw fully resident: out[i] = sum_k adj[i, k] @ xw[k]."""
    k = pl.program_id(1)
    tk = adj_ref.shape[1]
    start = pl.multiple_of(k * tk, tk)
    prod = jnp.dot(adj_ref[...], xw_ref[pl.ds(start, tk), :],
                   preferred_element_type=jnp.float32)

    @pl.when(k == 0)
    def _():
        o_ref[...] = prod          # initialize with the first partial product

    @pl.when(k > 0)
    def _():
        o_ref[...] += prod         # output block is resident across the k axis


def _adj_xw_stream_kernel(adj_ref, xw_ref, o_ref):
    """Stage 2 fallback for huge N: xw streamed in K-slabs."""
    k = pl.program_id(1)
    prod = jnp.dot(adj_ref[...], xw_ref[...], preferred_element_type=jnp.float32)

    @pl.when(k == 0)
    def _():
        o_ref[...] = prod

    @pl.when(k > 0)
    def _():
        o_ref[...] += prod


# ---------------------------------------------------------------------------
# Forward wrapper
# ---------------------------------------------------------------------------

@functools.partial(jax.jit, static_argnames=("tm", "tk", "mxu_dtype"))
def graph_linear_forward(adj, x, w, *, tm=None, tk=None, mxu_dtype=None):
    """(adj @ x) @ w with Pallas TPU kernels (fused small-N / two-stage large-N)."""
    N, N2 = adj.shape
    Nx, in_f = x.shape
    in_f2, out_f = w.shape
    assert N == N2 == Nx, "adjacency / feature row counts must match"
    assert in_f == in_f2, "feature / weight inner dims must match"

    out_dtype = x.dtype

    # Lane-dense output: pad out_features up to a multiple of 128 with zero
    # columns; the extra columns are sliced off after the kernel.
    out_f_pad = _round_up(out_f, 128)
    if out_f_pad != out_f:
        w = jnp.pad(w, ((0, 0), (0, out_f_pad - out_f)))

    # Optional bf16 MXU inputs (accumulation stays f32 in every matmul).
    if mxu_dtype is not None:
        adj = adj.astype(mxu_dtype)
        x = x.astype(mxu_dtype)
        w = w.astype(mxu_dtype)
    compute_dtype = x.dtype

    if N <= 1024:
        # ----------------- fused single-kernel small-N path -----------------
        if tm is None:
            tm = min(256, _round_up(N, 8))
        tm = max(8, _round_up(tm, 8))
        n_pad = _round_up(N, tm)
        if n_pad != N:
            adj = jnp.pad(adj, ((0, n_pad - N), (0, n_pad - N)))
            x = jnp.pad(x, ((0, n_pad - N), (0, 0)))

        out_pad = pl.pallas_call(
            _fused_kernel,
            out_shape=jax.ShapeDtypeStruct((n_pad, out_f_pad), jnp.float32),
            grid=(n_pad // tm,),
            in_specs=[
                pl.BlockSpec((tm, n_pad), lambda i: (i, 0)),       # adj row block
                pl.BlockSpec((n_pad, in_f), lambda i: (0, 0)),     # full x (resident)
                pl.BlockSpec((in_f, out_f_pad), lambda i: (0, 0)), # full W (resident)
            ],
            out_specs=pl.BlockSpec((tm, out_f_pad), lambda i: (i, 0)),
            compiler_params=pltpu.CompilerParams(
                dimension_semantics=("parallel",),
            ),
        )(adj, x, w)
    else:
        # ------------------------ two-stage large-N path ---------------------
        if tm is None:
            tm = 512
        if tk is None:
            tk = 512
        assert tm % 8 == 0 and tk % 128 == 0, "tm must be 8-mult, tk 128-mult"

        rows_pad = _round_up(N, tm)
        cols_pad = _round_up(N, tk)
        if rows_pad != N or cols_pad != N:
            adj = jnp.pad(adj, ((0, rows_pad - N), (0, cols_pad - N)))
        if cols_pad != N:
            x = jnp.pad(x, ((0, cols_pad - N), (0, 0)))

        # ---- stage 1: xw = x @ W_pad (tiny; row tile decoupled from tk) ----
        tn = 256 if cols_pad % 256 == 0 else tk
        xw = pl.pallas_call(
            _xw_kernel,
            out_shape=jax.ShapeDtypeStruct((cols_pad, out_f_pad), compute_dtype),
            grid=(cols_pad // tn,),
            in_specs=[
                pl.BlockSpec((tn, in_f), lambda i: (i, 0)),
                pl.BlockSpec((in_f, out_f_pad), lambda i: (0, 0)),
            ],
            out_specs=pl.BlockSpec((tn, out_f_pad), lambda i: (i, 0)),
            compiler_params=pltpu.CompilerParams(
                dimension_semantics=("parallel",),
            ),
        )(x, w)

        # ---- stage 2: out = adj @ xw ----
        xw_bytes = cols_pad * out_f_pad * jnp.dtype(compute_dtype).itemsize
        xw_resident = 2 * xw_bytes <= 8 * 1024 * 1024  # headroom within v7x 64 MiB
        if xw_resident:
            stage2_kernel = _adj_xw_resident_kernel
            xw_spec = pl.BlockSpec((cols_pad, out_f_pad), lambda i, k: (0, 0))
        else:
            stage2_kernel = _adj_xw_stream_kernel
            xw_spec = pl.BlockSpec((tk, out_f_pad), lambda i, k: (k, 0))

        out_pad = pl.pallas_call(
            stage2_kernel,
            out_shape=jax.ShapeDtypeStruct((rows_pad, out_f_pad), jnp.float32),
            grid=(rows_pad // tm, cols_pad // tk),
            in_specs=[
                pl.BlockSpec((tm, tk), lambda i, k: (i, k)),   # adj tile
                xw_spec,                                       # xw (resident or K-slab)
            ],
            out_specs=pl.BlockSpec((tm, out_f_pad), lambda i, k: (i, 0)),
            compiler_params=pltpu.CompilerParams(
                dimension_semantics=("parallel", "arbitrary"),
                vmem_limit_bytes=48 * 1024 * 1024,
            ),
        )(adj, xw)

    out = out_pad[:N, :out_f]
    if out.dtype != out_dtype:
        out = out.astype(out_dtype)
    return out


def init_weight(key, in_features, out_features, gain=1.414, dtype=jnp.float32):
    """xavier_normal_ equivalent: std = gain * sqrt(2 / (fan_in + fan_out))."""
    std = gain * (2.0 / (in_features + out_features)) ** 0.5
    return (std * jax.random.normal(key, (in_features, out_features))).astype(dtype)


if __name__ == "__main__":
    key = jax.random.PRNGKey(0)
    k_adj, k_x, k_w, k_rest = jax.random.split(key, 4)

    # Small, TPU-friendly demo shape (fused path): N=128, in=64, out=32.
    N, in_features, out_features = 128, 64, 32
    adj = jax.random.uniform(k_adj, (N, N), dtype=jnp.float32)
    x = jax.random.normal(k_x, (N, in_features), dtype=jnp.float32)
    w = init_weight(k_w, in_features, out_features)

    out = jax.block_until_ready(graph_linear_forward(adj, x, w))
    ref = (adj @ x) @ w
    assert out.shape == (N, out_features)
    assert jnp.allclose(out, ref, rtol=1e-4, atol=1e-4), "small-N mismatch vs reference"

    # Non-tile-divisible N (two-stage path, exercises zero-padding): N=1280.
    N2 = 1280
    ka2, kx2 = jax.random.split(k_rest)
    adj2 = jax.random.uniform(ka2, (N2, N2), dtype=jnp.float32) / N2
    x2 = jax.random.normal(kx2, (N2, in_features), dtype=jnp.float32)
    out2 = jax.block_until_ready(graph_linear_forward(adj2, x2, w))
    ref2 = (adj2 @ x2) @ w
    assert out2.shape == (N2, out_features)
    assert jnp.allclose(out2, ref2, rtol=1e-4, atol=1e-4), "large-N mismatch vs reference"

    print("KERNEL_OK")
</pallas_src>

<mosaic_0001>
module attributes {stable_mosaic.version = 11 : i64} {
  func.func @_fused_kernel(%arg0: i32, %arg1: memref<128x128xf32, #tpu.memory_space<vmem>>, %arg2: memref<128x64xf32, #tpu.memory_space<vmem>>, %arg3: memref<64x128xf32, #tpu.memory_space<vmem>>, %arg4: memref<128x128xf32, #tpu.memory_space<vmem>>) attributes {dimension_semantics = [#tpu.dimension_semantics<parallel>], iteration_bounds = array<i64: 1>, scalar_prefetch = 0 : i64, scratch_operands = 0 : i64, tpu.core_type = #tpu.core_type<tc>, window_params = [{transform_indices = @transform_0, window_bounds = array<i64: 128, 128>}, {pipeline_mode = #tpu.pipeline_mode<synchronous>, transform_indices = @transform_1, window_bounds = array<i64: 128, 64>}, {pipeline_mode = #tpu.pipeline_mode<synchronous>, transform_indices = @transform_2, window_bounds = array<i64: 64, 128>}, {transform_indices = @transform_3, window_bounds = array<i64: 128, 128>}]} {
    %c0 = arith.constant 0 : index
    %c0_0 = arith.constant 0 : index
    %0 = vector.load %arg1[%c0, %c0_0] : memref<128x128xf32, #tpu.memory_space<vmem>>, vector<128x128xf32>
    %c0_1 = arith.constant 0 : index
    %c0_2 = arith.constant 0 : index
    %1 = vector.load %arg2[%c0_1, %c0_2] : memref<128x64xf32, #tpu.memory_space<vmem>>, vector<128x64xf32>
    %cst = arith.constant dense<0.000000e+00> : vector<128x64xf32>
    %2 = tpu.matmul %0, %1, %cst {dimension_numbers = #tpu.dot_dimension_numbers<[1], [0], [0], [1], [0, 0, 1, 1], [], []>} : vector<128x128xf32>, vector<128x64xf32>, vector<128x64xf32> -> vector<128x64xf32>
    %c0_3 = arith.constant 0 : index
    %c0_4 = arith.constant 0 : index
    %3 = vector.load %arg3[%c0_3, %c0_4] : memref<64x128xf32, #tpu.memory_space<vmem>>, vector<64x128xf32>
    %cst_5 = arith.constant dense<0.000000e+00> : vector<128x128xf32>
    %4 = tpu.matmul %2, %3, %cst_5 {dimension_numbers = #tpu.dot_dimension_numbers<[1], [0], [0], [1], [0, 0, 1, 1], [], []>} : vector<128x64xf32>, vector<64x128xf32>, vector<128x128xf32> -> vector<128x128xf32>
    %c0_6 = arith.constant 0 : index
    %c0_7 = arith.constant 0 : index
    %5 = vector.load %arg4[%c0_6, %c0_7] : memref<128x128xf32, #tpu.memory_space<vmem>>, vector<128x128xf32>
    tpu.vector_store %arg4[%c0_6, %c0_7], %4 {strides = array<i32>} : memref<128x128xf32, #tpu.memory_space<vmem>>, vector<128x128xf32>,
    return
  }
  func.func @transform_0(%arg0: i32) -> (i32, i32) {
    %c0_i32 = arith.constant 0 : i32
    %c0_i32_0 = arith.constant 0 : i32
    return %arg0, %c0_i32 : i32, i32
  }
  func.func @transform_1(%arg0: i32) -> (i32, i32) {
    %c0_i32 = arith.constant 0 : i32
    %c0_i32_0 = arith.constant 0 : i32
    %c0_i32_1 = arith.constant 0 : i32
    return %c0_i32, %c0_i32_0 : i32, i32
  }
  func.func @transform_2(%arg0: i32) -> (i32, i32) {
    %c0_i32 = arith.constant 0 : i32
    %c0_i32_0 = arith.constant 0 : i32
    %c0_i32_1 = arith.constant 0 : i32
    return %c0_i32, %c0_i32_0 : i32, i32
  }
  func.func @transform_3(%arg0: i32) -> (i32, i32) {
    %c0_i32 = arith.constant 0 : i32
    %c0_i32_0 = arith.constant 0 : i32
    return %arg0, %c0_i32 : i32, i32
  }
}

</mosaic_0001>

<bundles_post_ra>
// kernel: graph_linear_forward.1
= control target key start
LH: loop header
LB: loop body
LE: loop exit
PB: predicated region body
PF: predicated region fallthrough
CT: control target
= control target key end

     0   :  { %vm119_vm0 = vcmask 523264   ;;  %s497_s1 = inlined_call_operand.vmem [shape: f32[128,64], index: 1, kind: input, shape index: {}]   ;;  %s498_s0 = inlined_call_operand.vmem [shape: f32[128,128], index: 0, kind: input, shape index: {}]   ;;  %s499_s2 = inlined_call_operand.vmem [shape: f32[64,128], index: 2, kind: input, shape index: {}]   ;;  %s500_s3 = inlined_call_operand.vmem [shape: f32[128,128], index: 3, kind: output, shape index: {}]  }
   0x1   :  { %v45_v0 = vld [vmem:[%s497_s1 + $0x78] sm:$0xff]  ;;  %v44_v1 = vld [vmem:[%s497_s1 + $0x70] sm:$0xff]  ;;  %v43_v2 = vld [vmem:[%s497_s1 + $0x68] sm:$0xff] }
   0x2   :  { %46 = vmatpush.msra.mxu0 %v45_v0  ;;  %269 = vmatpush.msra.mxu2 %v45_v0  ;;  %v42_v3 = vld [vmem:[%s497_s1 + $0x60] sm:$0xff]  ;;  %v41_v4 = vld [vmem:[%s497_s1 + $0x58] sm:$0xff]  ;;  %v40_v5 = vld [vmem:[%s497_s1 + $0x50] sm:$0xff] }
   0x3   :  { %v39_v6 = vld [vmem:[%s497_s1 + $0x48] sm:$0xff]  ;;  %v38_v7 = vld [vmem:[%s497_s1 + $0x40] sm:$0xff]  ;;  %v37_v8 = vld [vmem:[%s497_s1 + $0x38] sm:$0xff] }
   0x4   :  { %47 = vmatpush.msra.mxu0 %v44_v1  ;;  %270 = vmatpush.msra.mxu2 %v44_v1  ;;  %v36_v9 = vld [vmem:[%s497_s1 + $0x30] sm:$0xff]  ;;  %v35_v10 = vld [vmem:[%s497_s1 + $0x28] sm:$0xff]  ;;  %v34_v11 = vld [vmem:[%s497_s1 + $0x20] sm:$0xff] }
   0x5   :  { %v33_v12 = vld [vmem:[%s497_s1 + $0x18] sm:$0xff]  ;;  %v32_v13 = vld [vmem:[%s497_s1 + $0x10] sm:$0xff]  ;;  %v31_v14 = vld [vmem:[%s497_s1 + $0x8] sm:$0xff] }
   0x6   :  { %48 = vmatpush.msra.mxu0 %v43_v2  ;;  %271 = vmatpush.msra.mxu2 %v43_v2  ;;  %v30_v15 = vld [vmem:[%s497_s1] sm:$0xff]  ;;  %v21_v17 = vld [vmem:[%s498_s0 + $0x38] sm:$0xff]  ;;  %v15_v18 = vld [vmem:[%s498_s0 + $0x8] sm:$0xff] }
   0x7   :  { %v14_v16 = vld [vmem:[%s498_s0] sm:$0xff]  ;;  %v16_v20 = vld [vmem:[%s498_s0 + $0x10] sm:$0xff]  ;;  %v23_v21 = vld [vmem:[%s498_s0 + $0x48] sm:$0xff] }
   0x8   :  { %49 = vmatpush.msra.mxu0 %v42_v3  ;;  %272 = vmatpush.msra.mxu2 %v42_v3  ;;  %v22_v19 = vld [vmem:[%s498_s0 + $0x40] sm:$0xff]  ;;  %v17_v22 = vld [vmem:[%s498_s0 + $0x18] sm:$0xff]  ;;  %v24_v23 = vld [vmem:[%s498_s0 + $0x50] sm:$0xff] }
   0x9   :  { %v18_v24 = vld [vmem:[%s498_s0 + $0x20] sm:$0xff]  ;;  %v25_v25 = vld [vmem:[%s498_s0 + $0x58] sm:$0xff]  ;;  %v117_v27 = vld [vmem:[%s499_s2 + $0x30] sm:$0xff] }
   0xa   :  { %50 = vmatpush.msra.mxu0 %v41_v4  ;;  %273 = vmatpush.msra.mxu2 %v41_v4  ;;  %v118_v26 = vld [vmem:[%s499_s2 + $0x38] sm:$0xff]  ;;  %v116_v28 = vld [vmem:[%s499_s2 + $0x28] sm:$0xff]  ;;  %v115_v29 = vld [vmem:[%s499_s2 + $0x20] sm:$0xff] }
   0xb   :  { %176 = vmatpush.msra.mxu1 %v118_v26  ;;  %285 = vmatpush.msra.mxu3 %v118_v26  ;;  %v19_v30 = vld [vmem:[%s498_s0 + $0x28] sm:$0xff]  ;;  %v26_v31 = vld [vmem:[%s498_s0 + $0x60] sm:$0xff]  ;;  %v114_v32 = vld [vmem:[%s499_s2 + $0x18] sm:$0xff] }
   0xc   :  { %51 = vmatpush.msra.mxu0 %v40_v5  ;;  %274 = vmatpush.msra.mxu2 %v40_v5  ;;  %v113_v33 = vld [vmem:[%s499_s2 + $0x10] sm:$0xff]  ;;  %v112_v34 = vld [vmem:[%s499_s2 + $0x8] sm:$0xff]  ;;  %v29_v38 = vld [vmem:[%s498_s0 + $0x78] sm:$0xff] }
   0xd   :  { %177 = vmatpush.msra.mxu1 %v117_v27  ;;  %286 = vmatpush.msra.mxu3 %v117_v27  ;;  %v20_v35 = vld [vmem:[%s498_s0 + $0x30] sm:$0xff]  ;;  %v27_v36 = vld [vmem:[%s498_s0 + $0x68] sm:$0xff]  ;;  %v111_v39 = vld [vmem:[%s499_s2] sm:$0xff] }
   0xe   :  { %52 = vmatpush.msra.mxu0 %v39_v6  ;;  %275 = vmatpush.msra.mxu2 %v39_v6  ;;  %v28_v37 = vld [vmem:[%s498_s0 + $0x70] sm:$0xff] }
   0xf   :  { %178 = vmatpush.msra.mxu1 %v116_v28  ;;  %287 = vmatpush.msra.mxu3 %v116_v28 }
  0x10   :  { %53 = vmatpush.msra.mxu0 %v38_v7  ;;  %276 = vmatpush.msra.mxu2 %v38_v7 }
  0x11   :  { %179 = vmatpush.msra.mxu1 %v115_v29  ;;  %288 = vmatpush.msra.mxu3 %v115_v29 }
  0x12   :  { %54 = vmatpush.msra.mxu0 %v37_v8  ;;  %277 = vmatpush.msra.mxu2 %v37_v8 }
  0x13   :  { %180 = vmatpush.msra.mxu1 %v114_v32  ;;  %289 = vmatpush.msra.mxu3 %v114_v32 }
  0x14   :  { %55 = vmatpush.msra.mxu0 %v36_v9  ;;  %278 = vmatpush.msra.mxu2 %v36_v9 }
  0x15   :  { %181 = vmatpush.msra.mxu1 %v113_v33  ;;  %290 = vmatpush.msra.mxu3 %v113_v33 }
  0x16   :  { %56 = vmatpush.msra.mxu0 %v35_v10  ;;  %279 = vmatpush.msra.mxu2 %v35_v10 }
  0x17   :  { %182 = vmatpush.msra.mxu1 %v112_v34  ;;  %291 = vmatpush.msra.mxu3 %v112_v34 }
  0x18   :  { %57 = vmatpush.msra.mxu0 %v34_v11  ;;  %280 = vmatpush.msra.mxu2 %v34_v11 }
  0x19   :  { %183 = vmatpush.msra.mxu1 %v111_v39  ;;  %292 = vmatpush.msra.mxu3 %v111_v39 }
  0x1a   :  { %58 = vmatpush.msra.mxu0 %v33_v12  ;;  %281 = vmatpush.msra.mxu2 %v33_v12 }
  0x1c   :  { %59 = vmatpush.msra.mxu0 %v32_v13  ;;  %282 = vmatpush.msra.mxu2 %v32_v13 }
  0x1e   :  { %60 = vmatpush.msra.mxu0 %v31_v14  ;;  %283 = vmatpush.msra.mxu2 %v31_v14 }
  0x20   :  { %61 = vmatpush.msra.mxu0 %v30_v15  ;;  %284 = vmatpush.msra.mxu2 %v30_v15 }
  0x21   :  { %62 = vmatmul.f32.vlgmr.msra.gmra.mxu0 %v14_v16  ;;  %83 = vmatmul.f32.vlgmr.msra.gmra.mxu2 %v21_v17 }
  0x29   :  { %65 = vmatmul.f32.gmra.mxu0 %v15_v18  ;;  %86 = vmatmul.f32.gmra.mxu2 %v22_v19 }
  0x31   :  { %68 = vmatmul.f32.gmra.mxu0 %v16_v20  ;;  %89 = vmatmul.f32.gmra.mxu2 %v23_v21 }
  0x39   :  { %71 = vmatmul.f32.gmra.mxu0 %v17_v22  ;;  %92 = vmatmul.f32.gmra.mxu2 %v24_v23 }
  0x41   :  { %74 = vmatmul.f32.gmra.mxu0 %v18_v24  ;;  %95 = vmatmul.f32.gmra.mxu2 %v25_v25 }
  0x49   :  { %77 = vmatmul.f32.gmra.mxu0 %v19_v30  ;;  %98 = vmatmul.f32.gmra.mxu2 %v26_v31 }
  0x51   :  { %80 = vmatmul.f32.gmra.mxu0 %v20_v35  ;;  %101 = vmatmul.f32.gmra.mxu2 %v27_v36 }
  0x59   :  { %104 = vmatmul.f32.gmra.mxu2 %v28_v37 }
  0x61   :  { %107 = vmatmul.f32.gmra.mxu2 %v29_v38 }
  0x9e   :  { %v63_v40 = vpop.f32.mrf.mxu0 }
  0x9f   :  { %253 = vmatmul.msk.f32.vlgmr.msra.gmra.mxu1 %vm119_vm0, %v63_v40 }
  0xa4   :  { %v84_v41 = vpop.f32.mrf.mxu2 }
  0xa6   :  { %v66_v42 = vpop.f32.mrf.mxu0 }
  0xa7   :  { %254 = vmatmul.msk.f32.gmra.mxu1 %vm119_vm0, %v66_v42 }
  0xac   :  { %v87_v43 = vpop.f32.mrf.mxu2 }
  0xae   :  { %v69_v44 = vpop.f32.mrf.mxu0 }
  0xaf   :  { %255 = vmatmul.msk.f32.gmra.mxu1 %vm119_vm0, %v69_v44 }
  0xb4   :  { %v90_v45 = vpop.f32.mrf.mxu2 }
  0xb5   :  { %262 = vmatmul.msk.f32.vlgmr.msra.gmra.mxu3 %vm119_vm0, %v90_v45 }
  0xb6   :  { %v72_v46 = vpop.f32.mrf.mxu0 }
  0xb7   :  { %256 = vmatmul.msk.f32.gmra.mxu1 %vm119_vm0, %v72_v46 }
  0xbc   :  { %v93_v47 = vpop.f32.mrf.mxu2 }
  0xbd   :  { %263 = vmatmul.msk.f32.gmra.mxu3 %vm119_vm0, %v93_v47 }
  0xbe   :  { %v75_v48 = vpop.f32.mrf.mxu0 }
  0xbf   :  { %257 = vmatmul.msk.f32.gmra.mxu1 %vm119_vm0, %v75_v48 }
  0xc4   :  { %v96_v49 = vpop.f32.mrf.mxu2 }
  0xc5   :  { %264 = vmatmul.msk.f32.gmra.mxu3 %vm119_vm0, %v96_v49 }
  0xc6   :  { %v78_v50 = vpop.f32.mrf.mxu0 }
  0xc7   :  { %258 = vmatmul.msk.f32.gmra.mxu1 %vm119_vm0, %v78_v50 }
  0xcc   :  { %v99_v51 = vpop.f32.mrf.mxu2 }
  0xcd   :  { %265 = vmatmul.msk.f32.gmra.mxu3 %vm119_vm0, %v99_v51 }
  0xce   :  { %v81_v52 = vpop.f32.mrf.mxu0 }
  0xcf   :  { %259 = vmatmul.msk.f32.gmra.mxu1 %vm119_vm0, %v81_v52 }
  0xd4   :  { %v102_v53 = vpop.f32.mrf.mxu2 }
  0xd5   :  { %266 = vmatmul.msk.f32.gmra.mxu3 %vm119_vm0, %v102_v53 }
  0xd7   :  { %260 = vmatmul.msk.f32.gmra.mxu1 %vm119_vm0, %v84_v41 }
  0xdc   :  { %v105_v54 = vpop.f32.mrf.mxu2 }
  0xdd   :  { %267 = vmatmul.msk.f32.gmra.mxu3 %vm119_vm0, %v105_v54 }
  0xdf   :  { %261 = vmatmul.msk.f32.gmra.mxu1 %vm119_vm0, %v87_v43 }
  0xe4   :  { %v108_v55 = vpop.f32.mrf.mxu2 }
  0xe5   :  { %268 = vmatmul.msk.f32.gmra.mxu3 %vm119_vm0, %v108_v55 }
 0x11c   :  { %v185_v56 = vpop.f32.mrf.mxu1 }
 0x11d   :  { %233 = vst [vmem:[%s500_s3] sm:$0xff] %v185_v56 }
 0x124   :  { %v188_v57 = vpop.f32.mrf.mxu1 }
 0x125   :  { %234 = vst [vmem:[%s500_s3 + $0x8] sm:$0xff] %v188_v57 }
 0x12c   :  { %v191_v58 = vpop.f32.mrf.mxu1 }
 0x12d   :  { %235 = vst [vmem:[%s500_s3 + $0x10] sm:$0xff] %v191_v58 }
 0x134   :  { %v194_v59 = vpop.f32.mrf.mxu1 }
 0x135   :  { %236 = vst [vmem:[%s500_s3 + $0x18] sm:$0xff] %v194_v59 }
 0x138   :  { %v212_v60 = vpop.f32.mrf.mxu3 }
 0x139   :  { %242 = vst [vmem:[%s500_s3 + $0x48] sm:$0xff] %v212_v60 }
 0x13c   :  { %v197_v61 = vpop.f32.mrf.mxu1 }
 0x13d   :  { %237 = vst [vmem:[%s500_s3 + $0x20] sm:$0xff] %v197_v61 }
 0x140   :  { %v215_v62 = vpop.f32.mrf.mxu3 }
 0x141   :  { %243 = vst [vmem:[%s500_s3 + $0x50] sm:$0xff] %v215_v62 }
 0x144   :  { %v200_v63 = vpop.f32.mrf.mxu1 }
 0x145   :  { %238 = vst [vmem:[%s500_s3 + $0x28] sm:$0xff] %v200_v63 }
 0x148   :  { %v218_v0 = vpop.f32.mrf.mxu3 }
 0x149   :  { %244 = vst [vmem:[%s500_s3 + $0x58] sm:$0xff] %v218_v0 }
 0x14c   :  { %v203_v1 = vpop.f32.mrf.mxu1 }
 0x14d   :  { %239 = vst [vmem:[%s500_s3 + $0x30] sm:$0xff] %v203_v1 }
 0x150   :  { %v221_v2 = vpop.f32.mrf.mxu3 }
 0x151   :  { %245 = vst [vmem:[%s500_s3 + $0x60] sm:$0xff] %v221_v2 }
 0x154   :  { %v206_v3 = vpop.f32.mrf.mxu1 }
 0x155   :  { %240 = vst [vmem:[%s500_s3 + $0x38] sm:$0xff] %v206_v3 }
 0x158   :  { %v224_v4 = vpop.f32.mrf.mxu3 }
 0x159   :  { %246 = vst [vmem:[%s500_s3 + $0x68] sm:$0xff] %v224_v4 }
 0x15c   :  { %v209_v5 = vpop.f32.mrf.mxu1 }
 0x15d   :  { %241 = vst [vmem:[%s500_s3 + $0x40] sm:$0xff] %v209_v5 }
 0x160   :  { %v227_v6 = vpop.f32.mrf.mxu3 }
 0x161   :  { %247 = vst [vmem:[%s500_s3 + $0x70] sm:$0xff] %v227_v6 }
 0x168   :  { %v230_v7 = vpop.f32.mrf.mxu3 }
 0x169   :  { %248 = vst [vmem:[%s500_s3 + $0x78] sm:$0xff] %v230_v7 }

</bundles_post_ra>
